<compile_context>
chip_gen: v5e
topology: v5e:2x2
jax: 0.10.0
libtpu: 0.0.40
codegen_flags: <defaults>
</compile_context>

<pallas_src>
import functools

import jax
import jax.numpy as jnp
from jax import lax
from jax.experimental import pallas as pl
from jax.experimental.pallas import tpu as pltpu


def _round_up(x, m):
    return (x + m - 1) // m * m


def _mlp_kernel(x_ref, w_in_ref, b_in_ref, w_h_ref, b_h_ref,
                w_out_ref, b_out_ref, o_ref, *, n_layer):
    """Fused MLP: input linear + tanh, n_layer residual blocks, output linear."""
    act = jnp.tanh

    x = x_ref[...].astype(jnp.float32)                           # (tm, Din_p)

    # input layer
    r = jnp.dot(x, w_in_ref[...], preferred_element_type=jnp.float32)
    r = act(r + b_in_ref[...])                                   # (tm, H_p)

    # residual hidden stack
    def body(i, r):
        h = jnp.dot(r, w_h_ref[i], preferred_element_type=jnp.float32)
        h = h + b_h_ref[i]                                       # (tm,H_p)+(1,H_p)
        return r + act(h)

    r = lax.fori_loop(0, n_layer, body, r, unroll=True)

    # output layer
    out = jnp.dot(r, w_out_ref[...], preferred_element_type=jnp.float32)
    out = out + b_out_ref[...]                                   # (tm, Dout_p)
    o_ref[...] = out.astype(o_ref.dtype)


def mlp_pallas(x, params, *, tm=256):
    """x: (..., input_dim).  params: dict of weights in (in, out) layout."""
    w_in, b_in = params["w_in"], params["b_in"]
    w_h, b_h = params["w_h"], params["b_h"]
    w_out, b_out = params["w_out"], params["b_out"]

    n_layer = w_h.shape[0]
    d_in = w_in.shape[0]
    hidden = w_in.shape[1]
    d_out = w_out.shape[1]

    # ---- lane-dense padding of feature dims (multiples of 128) ----
    d_in_p = _round_up(d_in, 128)
    h_p = _round_up(hidden, 128)
    d_out_p = _round_up(d_out, 128)

    orig_shape = x.shape
    xf = x.reshape(-1, d_in)
    n = xf.shape[0]

    # ---- row tile: multiple of 8, at most tm, pad N up to a tile multiple ----
    tm_eff = min(_round_up(tm, 8), _round_up(n, 8))
    n_p = _round_up(n, tm_eff)

    xf_p = jnp.pad(xf, ((0, n_p - n), (0, d_in_p - d_in)))
    w_in_p = jnp.pad(w_in, ((0, d_in_p - d_in), (0, h_p - hidden)))
    b_in_p = jnp.pad(b_in, ((0, 0), (0, h_p - hidden)))
    w_h_p = jnp.pad(w_h, ((0, 0), (0, h_p - hidden), (0, h_p - hidden)))
    b_h_p = jnp.pad(b_h, ((0, 0), (0, 0), (0, h_p - hidden)))
    w_out_p = jnp.pad(w_out, ((0, h_p - hidden), (0, d_out_p - d_out)))
    b_out_p = jnp.pad(b_out, ((0, 0), (0, d_out_p - d_out)))

    grid = (n_p // tm_eff,)

    # ---- cost estimate (tanh -> EUP is the saturating unit) ----
    flops = 2 * n_p * (d_in_p * h_p + n_layer * h_p * h_p + h_p * d_out_p)
    transcendentals = n_p * h_p * (1 + n_layer)
    weight_bytes = 4 * (d_in_p * h_p + h_p
                        + n_layer * (h_p * h_p + h_p)
                        + h_p * d_out_p + d_out_p)
    bytes_accessed = weight_bytes + 4 * n_p * (d_in_p + d_out_p)
    cost = pl.CostEstimate(flops=flops,
                           transcendentals=transcendentals,
                           bytes_accessed=bytes_accessed)

    # ---- explicit VMEM budget: 2x weights (pipeline buffers) + act tiles ----
    tile_bytes = 4 * tm_eff * (d_in_p + d_out_p + 2 * h_p)
    vmem_limit = min(max(2 * weight_bytes + 2 * tile_bytes + (8 << 20),
                         32 << 20),
                     64 << 20)

    kernel = functools.partial(_mlp_kernel, n_layer=n_layer)

    out = pl.pallas_call(
        kernel,
        out_shape=jax.ShapeDtypeStruct((n_p, d_out_p), x.dtype),
        grid_spec=pltpu.PrefetchScalarGridSpec(
            num_scalar_prefetch=0,
            grid=grid,
            in_specs=[
                pl.BlockSpec((tm_eff, d_in_p), lambda i: (i, 0)),       # x rows
                pl.BlockSpec((d_in_p, h_p), lambda i: (0, 0)),          # w_in
                pl.BlockSpec((1, h_p), lambda i: (0, 0)),               # b_in
                pl.BlockSpec((n_layer, h_p, h_p), lambda i: (0, 0, 0)), # w_h
                pl.BlockSpec((n_layer, 1, h_p), lambda i: (0, 0, 0)),   # b_h
                pl.BlockSpec((h_p, d_out_p), lambda i: (0, 0)),         # w_out
                pl.BlockSpec((1, d_out_p), lambda i: (0, 0)),           # b_out
            ],
            out_specs=pl.BlockSpec((tm_eff, d_out_p), lambda i: (i, 0)),
        ),
        compiler_params=pltpu.CompilerParams(
            dimension_semantics=("parallel",),
            vmem_limit_bytes=vmem_limit),
        cost_estimate=cost,
    )(xf_p, w_in_p, b_in_p, w_h_p, b_h_p, w_out_p, b_out_p)

    out = out[:n, :d_out]
    return out.reshape(orig_shape[:-1] + (d_out,))


def init_mlp_params(key, input_dim, hidden_dim, output_dim, n_layer,
                    dtype=jnp.float32):
    """Deterministic init mimicking torch.nn.Linear's U(-1/sqrt(fan_in), ...).
    Weights stored transposed relative to PyTorch, i.e. (in, out)."""
    ks = jax.random.split(key, 6)

    def uniform(k, shape, fan_in):
        bound = 1.0 / jnp.sqrt(jnp.asarray(fan_in, jnp.float32))
        return jax.random.uniform(k, shape, dtype, -bound, bound)

    return {
        "w_in": uniform(ks[0], (input_dim, hidden_dim), input_dim),
        "b_in": uniform(ks[1], (1, hidden_dim), input_dim),
        "w_h": uniform(ks[2], (n_layer, hidden_dim, hidden_dim), hidden_dim),
        "b_h": uniform(ks[3], (n_layer, 1, hidden_dim), hidden_dim),
        "w_out": uniform(ks[4], (hidden_dim, output_dim), hidden_dim),
        "b_out": uniform(ks[5], (1, output_dim), hidden_dim),
    }


def mlp_reference(x, params):
    """Plain-JAX reference for correctness checking."""
    r = jnp.tanh(x @ params["w_in"] + params["b_in"][0])
    for i in range(params["w_h"].shape[0]):
        r = r + jnp.tanh(r @ params["w_h"][i] + params["b_h"][i, 0])
    return r @ params["w_out"] + params["b_out"][0]


if __name__ == "__main__":
    key = jax.random.PRNGKey(0)
    k_x, k_p = jax.random.split(key)

    # Small shapes consistent with the module: MLP(input_dim=4, hidden_dim=32,
    # output_dim=4, n_layer=3, act=tanh), input x of shape (batch=2, seq=8, 4).
    input_dim, hidden_dim, output_dim, n_layer = 4, 32, 4, 3
    x = jax.random.normal(k_x, (2, 8, input_dim), dtype=jnp.float32)

    params = init_mlp_params(k_p, input_dim, hidden_dim, output_dim, n_layer)

    y = mlp_pallas(x, params)
    y = jax.block_until_ready(y)

    y_ref = mlp_reference(x, params)
    assert y.shape == (2, 8, output_dim)
    assert jnp.allclose(y, y_ref, atol=1e-5, rtol=1e-5), "mismatch vs reference"

    print("KERNEL_OK")
</pallas_src>

<mosaic_0001>
module attributes {stable_mosaic.version = 11 : i64} {
  func.func @_mlp_kernel(%arg0: i32, %arg1: memref<16x128xf32, #tpu.memory_space<vmem>>, %arg2: memref<128x128xf32, #tpu.memory_space<vmem>>, %arg3: memref<1x128xf32, #tpu.memory_space<vmem>>, %arg4: memref<3x128x128xf32, #tpu.memory_space<vmem>>, %arg5: memref<3x1x128xf32, #tpu.memory_space<vmem>>, %arg6: memref<128x128xf32, #tpu.memory_space<vmem>>, %arg7: memref<1x128xf32, #tpu.memory_space<vmem>>, %arg8: memref<16x128xf32, #tpu.memory_space<vmem>>) attributes {dimension_semantics = [#tpu.dimension_semantics<parallel>], iteration_bounds = array<i64: 1>, scalar_prefetch = 0 : i64, scratch_operands = 0 : i64, tpu.core_type = #tpu.core_type<tc>, window_params = [{transform_indices = @transform_0, window_bounds = array<i64: 16, 128>}, {pipeline_mode = #tpu.pipeline_mode<synchronous>, transform_indices = @transform_1, window_bounds = array<i64: 128, 128>}, {pipeline_mode = #tpu.pipeline_mode<synchronous>, transform_indices = @transform_2, window_bounds = array<i64: 1, 128>}, {pipeline_mode = #tpu.pipeline_mode<synchronous>, transform_indices = @transform_3, window_bounds = array<i64: 3, 128, 128>}, {pipeline_mode = #tpu.pipeline_mode<synchronous>, transform_indices = @transform_4, window_bounds = array<i64: 3, 1, 128>}, {pipeline_mode = #tpu.pipeline_mode<synchronous>, transform_indices = @transform_5, window_bounds = array<i64: 128, 128>}, {pipeline_mode = #tpu.pipeline_mode<synchronous>, transform_indices = @transform_6, window_bounds = array<i64: 1, 128>}, {transform_indices = @transform_7, window_bounds = array<i64: 16, 128>}]} {
    %c0 = arith.constant 0 : index
    %c0_0 = arith.constant 0 : index
    %0 = vector.load %arg1[%c0, %c0_0] : memref<16x128xf32, #tpu.memory_space<vmem>>, vector<16x128xf32>
    %c0_1 = arith.constant 0 : index
    %c0_2 = arith.constant 0 : index
    %1 = vector.load %arg2[%c0_1, %c0_2] : memref<128x128xf32, #tpu.memory_space<vmem>>, vector<128x128xf32>
    %cst = arith.constant dense<0.000000e+00> : vector<16x128xf32>
    %2 = tpu.matmul %0, %1, %cst {dimension_numbers = #tpu.dot_dimension_numbers<[1], [0], [0], [1], [0, 0, 1, 1], [], []>} : vector<16x128xf32>, vector<128x128xf32>, vector<16x128xf32> -> vector<16x128xf32>
    %c0_3 = arith.constant 0 : index
    %c0_4 = arith.constant 0 : index
    %3 = vector.load %arg3[%c0_3, %c0_4] : memref<1x128xf32, #tpu.memory_space<vmem>>, vector<1x128xf32>
    %4 = vector.broadcast %3 : vector<1x128xf32> to vector<16x128xf32>
    %5 = arith.addf %2, %4 : vector<16x128xf32>
    %6 = math.tanh %5 : vector<16x128xf32>
    %c0_i32 = arith.constant 0 : i32
    %7 = arith.index_cast %c0_i32 : i32 to index
    %c0_5 = arith.constant 0 : index
    %c0_6 = arith.constant 0 : index
    %8 = vector.load %arg4[%7, %c0_5, %c0_6] : memref<3x128x128xf32, #tpu.memory_space<vmem>>, vector<1x128x128xf32>
    %9 = vector.shape_cast %8 : vector<1x128x128xf32> to vector<128x128xf32>
    %cst_7 = arith.constant dense<0.000000e+00> : vector<16x128xf32>
    %10 = tpu.matmul %6, %9, %cst_7 {dimension_numbers = #tpu.dot_dimension_numbers<[1], [0], [0], [1], [0, 0, 1, 1], [], []>} : vector<16x128xf32>, vector<128x128xf32>, vector<16x128xf32> -> vector<16x128xf32>
    %11 = arith.index_cast %c0_i32 : i32 to index
    %c0_8 = arith.constant 0 : index
    %c0_9 = arith.constant 0 : index
    %12 = vector.load %arg5[%11, %c0_8, %c0_9] : memref<3x1x128xf32, #tpu.memory_space<vmem>>, vector<1x1x128xf32>
    %13 = vector.shape_cast %12 : vector<1x1x128xf32> to vector<1x128xf32>
    %14 = vector.broadcast %13 : vector<1x128xf32> to vector<16x128xf32>
    %15 = arith.addf %10, %14 : vector<16x128xf32>
    %16 = math.tanh %15 : vector<16x128xf32>
    %17 = arith.addf %6, %16 : vector<16x128xf32>
    %c1_i32 = arith.constant 1 : i32
    %18 = arith.index_cast %c1_i32 : i32 to index
    %c0_10 = arith.constant 0 : index
    %c0_11 = arith.constant 0 : index
    %19 = vector.load %arg4[%18, %c0_10, %c0_11] : memref<3x128x128xf32, #tpu.memory_space<vmem>>, vector<1x128x128xf32>
    %20 = vector.shape_cast %19 : vector<1x128x128xf32> to vector<128x128xf32>
    %cst_12 = arith.constant dense<0.000000e+00> : vector<16x128xf32>
    %21 = tpu.matmul %17, %20, %cst_12 {dimension_numbers = #tpu.dot_dimension_numbers<[1], [0], [0], [1], [0, 0, 1, 1], [], []>} : vector<16x128xf32>, vector<128x128xf32>, vector<16x128xf32> -> vector<16x128xf32>
    %22 = arith.index_cast %c1_i32 : i32 to index
    %c0_13 = arith.constant 0 : index
    %c0_14 = arith.constant 0 : index
    %23 = vector.load %arg5[%22, %c0_13, %c0_14] : memref<3x1x128xf32, #tpu.memory_space<vmem>>, vector<1x1x128xf32>
    %24 = vector.shape_cast %23 : vector<1x1x128xf32> to vector<1x128xf32>
    %25 = vector.broadcast %24 : vector<1x128xf32> to vector<16x128xf32>
    %26 = arith.addf %21, %25 : vector<16x128xf32>
    %27 = math.tanh %26 : vector<16x128xf32>
    %28 = arith.addf %17, %27 : vector<16x128xf32>
    %c2_i32 = arith.constant 2 : i32
    %29 = arith.index_cast %c2_i32 : i32 to index
    %c0_15 = arith.constant 0 : index
    %c0_16 = arith.constant 0 : index
    %30 = vector.load %arg4[%29, %c0_15, %c0_16] : memref<3x128x128xf32, #tpu.memory_space<vmem>>, vector<1x128x128xf32>
    %31 = vector.shape_cast %30 : vector<1x128x128xf32> to vector<128x128xf32>
    %cst_17 = arith.constant dense<0.000000e+00> : vector<16x128xf32>
    %32 = tpu.matmul %28, %31, %cst_17 {dimension_numbers = #tpu.dot_dimension_numbers<[1], [0], [0], [1], [0, 0, 1, 1], [], []>} : vector<16x128xf32>, vector<128x128xf32>, vector<16x128xf32> -> vector<16x128xf32>
    %33 = arith.index_cast %c2_i32 : i32 to index
    %c0_18 = arith.constant 0 : index
    %c0_19 = arith.constant 0 : index
    %34 = vector.load %arg5[%33, %c0_18, %c0_19] : memref<3x1x128xf32, #tpu.memory_space<vmem>>, vector<1x1x128xf32>
    %35 = vector.shape_cast %34 : vector<1x1x128xf32> to vector<1x128xf32>
    %36 = vector.broadcast %35 : vector<1x128xf32> to vector<16x128xf32>
    %37 = arith.addf %32, %36 : vector<16x128xf32>
    %38 = math.tanh %37 : vector<16x128xf32>
    %39 = arith.addf %28, %38 : vector<16x128xf32>
    %c3_i32 = arith.constant 3 : i32
    %c0_20 = arith.constant 0 : index
    %c0_21 = arith.constant 0 : index
    %40 = vector.load %arg6[%c0_20, %c0_21] : memref<128x128xf32, #tpu.memory_space<vmem>>, vector<128x128xf32>
    %cst_22 = arith.constant dense<0.000000e+00> : vector<16x128xf32>
    %41 = tpu.matmul %39, %40, %cst_22 {dimension_numbers = #tpu.dot_dimension_numbers<[1], [0], [0], [1], [0, 0, 1, 1], [], []>} : vector<16x128xf32>, vector<128x128xf32>, vector<16x128xf32> -> vector<16x128xf32>
    %c0_23 = arith.constant 0 : index
    %c0_24 = arith.constant 0 : index
    %42 = vector.load %arg7[%c0_23, %c0_24] : memref<1x128xf32, #tpu.memory_space<vmem>>, vector<1x128xf32>
    %43 = vector.broadcast %42 : vector<1x128xf32> to vector<16x128xf32>
    %44 = arith.addf %41, %43 : vector<16x128xf32>
    %c0_25 = arith.constant 0 : index
    %c0_26 = arith.constant 0 : index
    %45 = vector.load %arg8[%c0_25, %c0_26] : memref<16x128xf32, #tpu.memory_space<vmem>>, vector<16x128xf32>
    tpu.vector_store %arg8[%c0_25, %c0_26], %44 {strides = array<i32>} : memref<16x128xf32, #tpu.memory_space<vmem>>, vector<16x128xf32>,
    return
  }
  func.func @transform_0(%arg0: i32) -> (i32, i32) {
    %c0_i32 = arith.constant 0 : i32
    %c0_i32_0 = arith.constant 0 : i32
    return %arg0, %c0_i32 : i32, i32
  }
  func.func @transform_1(%arg0: i32) -> (i32, i32) {
    %c0_i32 = arith.constant 0 : i32
    %c0_i32_0 = arith.constant 0 : i32
    %c0_i32_1 = arith.constant 0 : i32
    return %c0_i32, %c0_i32_0 : i32, i32
  }
  func.func @transform_2(%arg0: i32) -> (i32, i32) {
    %c0_i32 = arith.constant 0 : i32
    %c0_i32_0 = arith.constant 0 : i32
    %c0_i32_1 = arith.constant 0 : i32
    return %c0_i32, %c0_i32_0 : i32, i32
  }
  func.func @transform_3(%arg0: i32) -> (i32, i32, i32) {
    %c0_i32 = arith.constant 0 : i32
    %c0_i32_0 = arith.constant 0 : i32
    %c0_i32_1 = arith.constant 0 : i32
    %c0_i32_2 = arith.constant 0 : i32
    return %c0_i32, %c0_i32_0, %c0_i32_1 : i32, i32, i32
  }
  func.func @transform_4(%arg0: i32) -> (i32, i32, i32) {
    %c0_i32 = arith.constant 0 : i32
    %c0_i32_0 = arith.constant 0 : i32
    %c0_i32_1 = arith.constant 0 : i32
    %c0_i32_2 = arith.constant 0 : i32
    return %c0_i32, %c0_i32_0, %c0_i32_1 : i32, i32, i32
  }
  func.func @transform_5(%arg0: i32) -> (i32, i32) {
    %c0_i32 = arith.constant 0 : i32
    %c0_i32_0 = arith.constant 0 : i32
    %c0_i32_1 = arith.constant 0 : i32
    return %c0_i32, %c0_i32_0 : i32, i32
  }
  func.func @transform_6(%arg0: i32) -> (i32, i32) {
    %c0_i32 = arith.constant 0 : i32
    %c0_i32_0 = arith.constant 0 : i32
    %c0_i32_1 = arith.constant 0 : i32
    return %c0_i32, %c0_i32_0 : i32, i32
  }
  func.func @transform_7(%arg0: i32) -> (i32, i32) {
    %c0_i32 = arith.constant 0 : i32
    %c0_i32_0 = arith.constant 0 : i32
    return %arg0, %c0_i32 : i32, i32
  }
}

</mosaic_0001>

<bundles_post_ra>
// kernel: tpu_custom_call.1
= control target key start
LH: loop header
LB: loop body
LE: loop exit
PB: predicated region body
PF: predicated region fallthrough
CT: control target
= control target key end

     0   :  { %12 = vsyncpa [#allocation3], 0  ;;  %s653_s0 = inlined_call_operand.hbm [shape: f32[16,128], index: 0, kind: input, shape index: {}]   ;;  %s654_s1 = inlined_call_operand.hbm [shape: f32[128,128], index: 1, kind: input, shape index: {}]   ;;  %s655_s2 = inlined_call_operand.hbm [shape: f32[1,128], index: 2, kind: input, shape index: {}]   ;;  %s656_s3 = inlined_call_operand.hbm [shape: f32[3,128,128], index: 3, kind: input, shape index: {}]   ;;  %s657_s4 = inlined_call_operand.vmem [shape: f32[3,1,128], index: 4, kind: input, shape index: {}]   ;;  %s658_s5 = inlined_call_operand.hbm [shape: f32[128,128], index: 5, kind: input, shape index: {}]   ;;  %s659_s6 = inlined_call_operand.vmem [shape: f32[1,128], index: 6, kind: input, shape index: {}]   ;;  %s660_s7 = inlined_call_operand.hbm [shape: f32[16,128], index: 7, kind: output, shape index: {}]  }
   0x1   :  { %13 = vsyncpa [#allocation6], 0 }
   0x2   :  { %14 = vsyncpa [#allocation9], 0 }
   0x3   :  { %15 = vsyncpa [#allocation4], 0  ;;  %s33_s26 = sshll.u32 %s654_s1, 4  ;;  %s560_s27 = smov [#allocation5]   ;;  %s34_s26 = int_to_ptr.hbm [resolvable:$true] %s33_s26 }
   0x4   :  { %s35_s28 = sshll.u32 %s560_s27, 4  ;;  %s57_s8 = sshll.u32 %s656_s3, 4  ;;  %s36_s28 = int_to_ptr.vmem [resolvable:$true] %s35_s28  ;;  %s58_s8 = int_to_ptr.hbm [resolvable:$true] %s57_s8 }
   0x5   :  { %s561_s9 = smov 128   ;;  %s562_s10 = smov 8  }
   0x6   :  { %41 = dma.hbm_to_vmem [thread:$0]  %s34_s26, 2048, %s36_s28, [#allocation6], %s561_s9, %s561_s9, %s562_s10  }
   0x7   :  { %s563_s11 = smov [#allocation8]   ;;  %s20_s1 = sshll.u32 %s653_s0, 4  ;;  %s21_s1 = int_to_ptr.hbm [resolvable:$true] %s20_s1 }
   0x8   :  { %s59_s12 = sshll.u32 %s563_s11, 4  ;;  %s47_s16 = sshll.u32 %s655_s2, 4  ;;  %s60_s12 = int_to_ptr.vmem [resolvable:$true] %s59_s12  ;;  %s48_s16 = int_to_ptr.hbm [resolvable:$true] %s47_s16 }
   0x9   :  { %65 = dma.hbm_to_vmem [thread:$0]  %s58_s8, 6144, %s60_s12, [#allocation9], %s561_s9, %s561_s9, %s562_s10  }
   0xa   :  { %s564_s17 = smov [#allocation2]   ;;  %s565_s19 = smov [#allocation7]  }
   0xb   :  { %s22_s18 = sshll.u32 %s564_s17, 4  ;;  %s49_s0 = sshll.u32 %s565_s19, 4  ;;  %s23_s18 = int_to_ptr.vmem [resolvable:$true] %s22_s18  ;;  %s50_s0 = int_to_ptr.vmem [resolvable:$true] %s49_s0 }
   0xc   :  { %28 = dma.hbm_to_vmem [thread:$0]  %s21_s1, 256, %s23_s18, [#allocation3], %s561_s9, %s561_s9, %s562_s10  }
   0xd   :  { %s72_s22 = sshll.u32 %s658_s5, 4  ;;  %s566_s23 = smov [#allocation10]   ;;  %s73_s22 = int_to_ptr.hbm [resolvable:$true] %s72_s22 }
   0xe   :  { %52 = dma.hbm_to_vmem [thread:$0]  %s48_s16, 16, %s50_s0, [#allocation6]  }
   0xf   :  { %s74_s24 = sshll.u32 %s566_s23, 4  ;;  %s75_s24 = int_to_ptr.vmem [resolvable:$true] %s74_s24 }
  0x10   :  { %80 = dma.hbm_to_vmem [thread:$0]  %s73_s22, 2048, %s75_s24, [#allocation9], %s561_s9, %s561_s9, %s562_s10  }
  0x11   :  { %552 = dma.done.wait [#allocation3], 256  }
  0x12   :  { %553 = vsyncadd [#allocation3], 4294967040 }
  0x13   :  { %554 = dma.done.wait [#allocation6], 2064  }
  0x14   :  { %555 = vsyncadd [#allocation6], 4294965232 }
  0x15   :  { %556 = dma.done.wait [#allocation9], 8192  }
  0x16   :  { %557 = vsyncadd [#allocation9], 4294959104  ;;  %v120_v0 = vld [vmem:[#allocation5 + $0x78] sm:$0xff]  ;;  %v119_v1 = vld [vmem:[#allocation5 + $0x70] sm:$0xff]  ;;  %s346_s13 = sshll.u32 %s660_s7, 4  ;;  %s347_s13 = int_to_ptr.hbm [resolvable:$true] %s346_s13 }
  0x17   :  { %125 = vmatpush.msra.mxu0 %v120_v0  ;;  %v118_v2 = vld [vmem:[#allocation5 + $0x68] sm:$0xff]  ;;  %v117_v3 = vld [vmem:[#allocation5 + $0x60] sm:$0xff]  ;;  %v116_v4 = vld [vmem:[#allocation5 + $0x58] sm:$0xff] }
  0x18   :  { %v115_v5 = vld [vmem:[#allocation5 + $0x50] sm:$0xff]  ;;  %v165_v6 = vld [vmem:[#allocation8 + $0x78] sm:$0xff]  ;;  %v114_v8 = vld [vmem:[#allocation5 + $0x48] sm:$0xff] }
  0x19   :  { %126 = vmatpush.msra.mxu0 %v119_v1  ;;  %v164_v7 = vld [vmem:[#allocation8 + $0x70] sm:$0xff]  ;;  %170 = vmatpush.msra.mxu1 %v165_v6  ;;  %v163_v9 = vld [vmem:[#allocation8 + $0x68] sm:$0xff]  ;;  %v113_v10 = vld [vmem:[#allocation5 + $0x40] sm:$0xff] }
  0x1a   :  { %v162_v11 = vld [vmem:[#allocation8 + $0x60] sm:$0xff]  ;;  %v112_v12 = vld [vmem:[#allocation5 + $0x38] sm:$0xff]  ;;  %v111_v14 = vld [vmem:[#allocation5 + $0x30] sm:$0xff] }
  0x1b   :  { %127 = vmatpush.msra.mxu0 %v118_v2  ;;  %171 = vmatpush.msra.mxu1 %v164_v7  ;;  %v161_v13 = vld [vmem:[#allocation8 + $0x58] sm:$0xff]  ;;  %v160_v15 = vld [vmem:[#allocation8 + $0x50] sm:$0xff]  ;;  %v110_v16 = vld [vmem:[#allocation5 + $0x28] sm:$0xff] }
  0x1c   :  { %v159_v17 = vld [vmem:[#allocation8 + $0x48] sm:$0xff]  ;;  %v109_v18 = vld [vmem:[#allocation5 + $0x20] sm:$0xff]  ;;  %v108_v20 = vld [vmem:[#allocation5 + $0x18] sm:$0xff] }
  0x1d   :  { %128 = vmatpush.msra.mxu0 %v117_v3  ;;  %172 = vmatpush.msra.mxu1 %v163_v9  ;;  %v158_v19 = vld [vmem:[#allocation8 + $0x40] sm:$0xff]  ;;  %v157_v21 = vld [vmem:[#allocation8 + $0x38] sm:$0xff]  ;;  %v107_v22 = vld [vmem:[#allocation5 + $0x10] sm:$0xff] }
  0x1e   :  { %v156_v23 = vld [vmem:[#allocation8 + $0x30] sm:$0xff]  ;;  %v106_v24 = vld [vmem:[#allocation5 + $0x8] sm:$0xff]  ;;  %v105_v26 = vld [vmem:[#allocation5] sm:$0xff] }
  0x1f   :  { %129 = vmatpush.msra.mxu0 %v116_v4  ;;  %173 = vmatpush.msra.mxu1 %v162_v11  ;;  %v155_v25 = vld [vmem:[#allocation8 + $0x28] sm:$0xff]  ;;  %v104_v28 = vld [vmem:[#allocation2 + $0x8] sm:$0xff]  ;;  %v154_v29 = vld [vmem:[#allocation8 + $0x20] sm:$0xff] }
  0x20   :  { %v103_v27 = vld [vmem:[#allocation2] sm:$0xff]  ;;  %v153_v30 = vld [vmem:[#allocation8 + $0x18] sm:$0xff]  ;;  %v150_v33 = vld [vmem:[#allocation8] sm:$0xff] }
  0x21   :  { %130 = vmatpush.msra.mxu0 %v115_v5  ;;  %174 = vmatpush.msra.mxu1 %v161_v13  ;;  %v152_v31 = vld [vmem:[#allocation8 + $0x10] sm:$0xff]  ;;  %v151_v32 = vld [vmem:[#allocation8 + $0x8] sm:$0xff]  ;;  %v213_v34 = vld [vmem:[#allocation8 + $0xf8] sm:$0xff] }
  0x22   :  { %v212_v35 = vld [vmem:[#allocation8 + $0xf0] sm:$0xff]  ;;  %219 = vmatpush.msra.mxu2 %v213_v34  ;;  %v211_v36 = vld [vmem:[#allocation8 + $0xe8] sm:$0xff]  ;;  %v210_v37 = vld [vmem:[#allocation8 + $0xe0] sm:$0xff] }
  0x23   :  { %131 = vmatpush.msra.mxu0 %v114_v8  ;;  %175 = vmatpush.msra.mxu1 %v160_v15  ;;  %v209_v38 = vld [vmem:[#allocation8 + $0xd8] sm:$0xff]  ;;  %v208_v39 = vld [vmem:[#allocation8 + $0xd0] sm:$0xff]  ;;  %v207_v40 = vld [vmem:[#allocation8 + $0xc8] sm:$0xff] }
  0x24   :  { %220 = vmatpush.msra.mxu2 %v212_v35  ;;  %v387_v41 = vld [vmem:[#allocation7] ss:$0 sm:$0xff]  ;;  %v206_v42 = vld [vmem:[#allocation8 + $0xc0] sm:$0xff]  ;;  %v204_v46 = vld [vmem:[#allocation8 + $0xb0] sm:$0xff] }
  0x25   :  { %132 = vmatpush.msra.mxu0 %v113_v10  ;;  %176 = vmatpush.msra.mxu1 %v159_v17  ;;  %v205_v44 = vld [vmem:[#allocation8 + $0xb8] sm:$0xff]  ;;  %v203_v51 = vld [vmem:[#allocation8 + $0xa8] sm:$0xff]  ;;  %v202_v52 = vld [vmem:[#allocation8 + $0xa0] sm:$0xff] }
  0x26   :  { %221 = vmatpush.msra.mxu2 %v211_v36  ;;  %v201_v53 = vld [vmem:[#allocation8 + $0x98] sm:$0xff]  ;;  %v200_v54 = vld [vmem:[#allocation8 + $0x90] sm:$0xff]  ;;  %v199_v55 = vld [vmem:[#allocation8 + $0x88] sm:$0xff] }
  0x27   :  { %133 = vmatpush.msra.mxu0 %v112_v12  ;;  %177 = vmatpush.msra.mxu1 %v158_v19  ;;  %v198_v56 = vld [vmem:[#allocation8 + $0x80] sm:$0xff]  ;;  %v262_v57 = vld [vmem:[#allocation8 + $0x178] sm:$0xff]  ;;  %v261_v58 = vld [vmem:[#allocation8 + $0x170] sm:$0xff] }
  0x28   :  { %222 = vmatpush.msra.mxu2 %v210_v37  ;;  %268 = vmatpush.msra.mxu3 %v262_v57  ;;  %v260_v59 = vld [vmem:[#allocation8 + $0x168] sm:$0xff]  ;;  %v259_v60 = vld [vmem:[#allocation8 + $0x160] sm:$0xff]  ;;  %v258_v61 = vld [vmem:[#allocation8 + $0x158] sm:$0xff] }
  0x29   :  { %134 = vmatpush.msra.mxu0 %v111_v14  ;;  %178 = vmatpush.msra.mxu1 %v157_v21  ;;  %v257_v62 = vld [vmem:[#allocation8 + $0x150] sm:$0xff]  ;;  %v388_v63 = vld [vmem:[%s657_s4] ss:$0 sm:$0xff]  ;;  %v255_v2 = vld [vmem:[#allocation8 + $0x140] sm:$0xff] }
  0x2a   :  { %223 = vmatpush.msra.mxu2 %v209_v38  ;;  %269 = vmatpush.msra.mxu3 %v261_v58  ;;  %v256_v0 = vld [vmem:[#allocation8 + $0x148] sm:$0xff]  ;;  %v254_v4 = vld [vmem:[#allocation8 + $0x138] sm:$0xff]  ;;  %v253_v5 = vld [vmem:[#allocation8 + $0x130] sm:$0xff] }
  0x2b   :  { %135 = vmatpush.msra.mxu0 %v110_v16  ;;  %179 = vmatpush.msra.mxu1 %v156_v23  ;;  %v252_v12 = vld [vmem:[#allocation8 + $0x128] sm:$0xff]  ;;  %v251_v13 = vld [vmem:[#allocation8 + $0x120] sm:$0xff]  ;;  %v250_v14 = vld [vmem:[#allocation8 + $0x118] sm:$0xff] }
  0x2c   :  { %224 = vmatpush.msra.mxu2 %v208_v39  ;;  %270 = vmatpush.msra.mxu3 %v260_v59  ;;  %v249_v15 = vld [vmem:[#allocation8 + $0x110] sm:$0xff]  ;;  %v248_v16 = vld [vmem:[#allocation8 + $0x108] sm:$0xff]  ;;  %v247_v17 = vld [vmem:[#allocation8 + $0x100] sm:$0xff] }
  0x2d   :  { %136 = vmatpush.msra.mxu0 %v109_v18  ;;  %180 = vmatpush.msra.mxu1 %v155_v25  ;;  %v310_v18 = vld [vmem:[#allocation10 + $0x78] sm:$0xff]  ;;  %v309_v19 = vld [vmem:[#allocation10 + $0x70] sm:$0xff]  ;;  %v307_v21 = vld [vmem:[#allocation10 + $0x60] sm:$0xff] }
  0x2e   :  { %225 = vmatpush.msra.mxu2 %v207_v40  ;;  %271 = vmatpush.msra.mxu3 %v259_v60  ;;  %v305_v23 = vld [vmem:[#allocation10 + $0x50] sm:$0xff]  ;;  %v304_v25 = vld [vmem:[#allocation10 + $0x48] sm:$0xff]  ;;  %v299_v38 = vld [vmem:[#allocation10 + $0x20] sm:$0xff] }
  0x2f   :  { %137 = vmatpush.msra.mxu0 %v108_v20  ;;  %181 = vmatpush.msra.mxu1 %v154_v29  ;;  %v308_v20 = vld [vmem:[#allocation10 + $0x68] sm:$0xff]  ;;  %v302_v29 = vld [vmem:[#allocation10 + $0x38] sm:$0xff]  ;;  %v297_v40 = vld [vmem:[#allocation10 + $0x10] sm:$0xff] }
  0x30   :  { %226 = vmatpush.msra.mxu2 %v206_v42  ;;  %272 = vmatpush.msra.mxu3 %v258_v61  ;;  %v300_v37 = vld [vmem:[#allocation10 + $0x28] sm:$0xff]  ;;  %v298_v39 = vld [vmem:[#allocation10 + $0x18] sm:$0xff]  ;;  %v295_v42 = vld [vmem:[#allocation10] sm:$0xff] }
  0x31   :  { %138 = vmatpush.msra.mxu0 %v107_v22  ;;  %182 = vmatpush.msra.mxu1 %v153_v30  ;;  %v306_v22 = vld [vmem:[#allocation10 + $0x58] sm:$0xff]  ;;  %v301_v30 = vld [vmem:[#allocation10 + $0x30] sm:$0xff] }
  0x32   :  { %227 = vmatpush.msra.mxu2 %v205_v44  ;;  %273 = vmatpush.msra.mxu3 %v257_v62 }
  0x33   :  { %139 = vmatpush.msra.mxu0 %v106_v24  ;;  %183 = vmatpush.msra.mxu1 %v152_v31  ;;  %v389_v24 = vld [vmem:[%s657_s4 + $0x1] ss:$0 sm:$0xff] }
  0x34   :  { %228 = vmatpush.msra.mxu2 %v204_v46  ;;  %274 = vmatpush.msra.mxu3 %v256_v0 }
  0x35   :  { %140 = vmatpush.msra.mxu0 %v105_v26  ;;  %184 = vmatpush.msra.mxu1 %v151_v32 }
  0x36   :  { %141 = vmatmul.f32.vlgmr.msra.gmra.mxu0 %v103_v27  ;;  %229 = vmatpush.msra.mxu2 %v203_v51  ;;  %v303_v27 = vld [vmem:[#allocation10 + $0x40] sm:$0xff] }
  0x37   :  { %185 = vmatpush.msra.mxu1 %v150_v33  ;;  %275 = vmatpush.msra.mxu3 %v255_v2 }
  0x38   :  { %230 = vmatpush.msra.mxu2 %v202_v52  ;;  %315 = vmatpush.msrb.mxu0 %v310_v18  ;;  %v391_v52 = vld [vmem:[%s659_s6] ss:$0 sm:$0xff] }
  0x39   :  { %276 = vmatpush.msra.mxu3 %v254_v4  ;;  %363 = vmatpush.msrb.mxu1 %v310_v18 }
  0x3a   :  { %231 = vmatpush.msra.mxu2 %v201_v53  ;;  %316 = vmatpush.msrb.mxu0 %v309_v19 }
  0x3b   :  { %277 = vmatpush.msra.mxu3 %v253_v5  ;;  %364 = vmatpush.msrb.mxu1 %v309_v19 }
  0x3c   :  { %232 = vmatpush.msra.mxu2 %v200_v54  ;;  %317 = vmatpush.msrb.mxu0 %v308_v20 }
  0x3d   :  { %278 = vmatpush.msra.mxu3 %v252_v12  ;;  %365 = vmatpush.msrb.mxu1 %v308_v20 }
  0x3e   :  { %144 = vmatmul.f32.gmra.mxu0 %v104_v28  ;;  %233 = vmatpush.msra.mxu2 %v199_v55 }
  0x3f   :  { %279 = vmatpush.msra.mxu3 %v251_v13  ;;  %318 = vmatpush.msrb.mxu0 %v307_v21 }
  0x40   :  { %234 = vmatpush.msra.mxu2 %v198_v56  ;;  %366 = vmatpush.msrb.mxu1 %v307_v21 }
  0x41   :  { %280 = vmatpush.msra.mxu3 %v250_v14  ;;  %319 = vmatpush.msrb.mxu0 %v306_v22 }
  0x42   :  { %367 = vmatpush.msrb.mxu1 %v306_v22 }
  0x43   :  { %281 = vmatpush.msra.mxu3 %v249_v15  ;;  %320 = vmatpush.msrb.mxu0 %v305_v23 }
  0x44   :  { %368 = vmatpush.msrb.mxu1 %v305_v23 }
  0x45   :  { %282 = vmatpush.msra.mxu3 %v248_v16  ;;  %321 = vmatpush.msrb.mxu0 %v304_v25 }
  0x46   :  { %369 = vmatpush.msrb.mxu1 %v304_v25 }
  0x47   :  { %283 = vmatpush.msra.mxu3 %v247_v17  ;;  %322 = vmatpush.msrb.mxu0 %v303_v27 }
  0x48   :  { %370 = vmatpush.msrb.mxu1 %v303_v27 }
  0x49   :  { %323 = vmatpush.msrb.mxu0 %v302_v29 }
  0x4a   :  { %371 = vmatpush.msrb.mxu1 %v302_v29 }
  0x4b   :  { %324 = vmatpush.msrb.mxu0 %v301_v30 }
  0x4c   :  { %372 = vmatpush.msrb.mxu1 %v301_v30 }
  0x4d   :  { %325 = vmatpush.msrb.mxu0 %v300_v37 }
  0x4e   :  { %373 = vmatpush.msrb.mxu1 %v300_v37 }
  0x4f   :  { %326 = vmatpush.msrb.mxu0 %v299_v38 }
  0x50   :  { %374 = vmatpush.msrb.mxu1 %v299_v38 }
  0x51   :  { %327 = vmatpush.msrb.mxu0 %v298_v39 }
  0x52   :  { %375 = vmatpush.msrb.mxu1 %v298_v39 }
  0x53   :  { %328 = vmatpush.msrb.mxu0 %v297_v40 }
  0x54   :  { %376 = vmatpush.msrb.mxu1 %v297_v40 }
  0xb3   :  { %v142_v43 = vpop.f32.mrf.mxu0 }
  0xb4   :  { %v143_v45 = vadd.f32 %v387_v41, %v142_v43  ;;  %v390_v43 = vld [vmem:[%s657_s4 + $0x2] ss:$0 sm:$0xff]  ;;  %s567_s4 = smov [#allocation11]  }
  0xb5   :  { %s344_s8 = sshll.u32 %s567_s4, 4  ;;  %s345_s8 = int_to_ptr.vmem [resolvable:$true] %s344_s8 }
  0xb6   :  { %392 = vtanh.f32 %v143_v45 }
  0xbb   :  { %v145_v47 = vpop.f32.mrf.mxu0 }
  0xbc   :  { %v393_v48 = vpop.eup %392  ;;  %v146_v49 = vadd.f32 %v387_v41, %v145_v47  ;;  %v296_v41 = vld [vmem:[#allocation10 + $0x8] sm:$0xff] }
  0xbd   :  { %186 = vmatmul.f32.vlgmr.msra.gmra.mxu1 %v393_v48  ;;  %329 = vmatpush.msrb.mxu0 %v296_v41 }
  0xbe   :  { %394 = vtanh.f32 %v146_v49  ;;  %377 = vmatpush.msrb.mxu1 %v296_v41 }
  0xbf   :  { %330 = vmatpush.msrb.mxu0 %v295_v42 }
  0xc0   :  { %378 = vmatpush.msrb.mxu1 %v295_v42 }
  0xc4   :  { %v395_v50 = vpop.eup %394 }
  0xc5   :  { %189 = vmatmul.f32.gmra.mxu1 %v395_v50 }
 0x13a   :  { %v187_v1 = vpop.f32.mrf.mxu1 }
 0x13b   :  { %v188_v3 = vadd.f32 %v388_v63, %v187_v1 }
 0x13d   :  { %396 = vtanh.f32 %v188_v3 }
 0x142   :  { %v190_v6 = vpop.f32.mrf.mxu1 }
 0x143   :  { %v397_v7 = vpop.eup %396  ;;  %v191_v8 = vadd.f32 %v388_v63, %v190_v6 }
 0x144   :  { %v195_v9 = vadd.f32 %v397_v7, %v393_v48 }
 0x145   :  { %398 = vtanh.f32 %v191_v8 }
 0x146   :  { %235 = vmatmul.f32.vlgmr.msra.gmra.mxu2 %v195_v9 }
 0x14b   :  { %v399_v10 = vpop.eup %398 }
 0x14c   :  { %v196_v11 = vadd.f32 %v399_v10, %v395_v50 }
 0x14e   :  { %238 = vmatmul.f32.gmra.mxu2 %v196_v11 }
 0x1c9   :  { %v236_v26 = vpop.f32.mrf.mxu2 }
 0x1ca   :  { %v237_v28 = vadd.f32 %v389_v24, %v236_v26 }
 0x1cc   :  { %400 = vtanh.f32 %v237_v28 }
 0x1d1   :  { %v239_v31 = vpop.f32.mrf.mxu2 }
 0x1d2   :  { %v401_v32 = vpop.eup %400  ;;  %v240_v33 = vadd.f32 %v389_v24, %v239_v31 }
 0x1d3   :  { %v244_v34 = vadd.f32 %v401_v32, %v195_v9 }
 0x1d4   :  { %402 = vtanh.f32 %v240_v33 }
 0x1d5   :  { %284 = vmatmul.f32.vlgmr.msra.gmra.mxu3 %v244_v34 }
 0x1da   :  { %v403_v35 = vpop.eup %402 }
 0x1db   :  { %v245_v36 = vadd.f32 %v403_v35, %v196_v11 }
 0x1dd   :  { %287 = vmatmul.f32.gmra.mxu3 %v245_v36 }
 0x258   :  { %v285_v44 = vpop.f32.mrf.mxu3 }
 0x259   :  { %v286_v45 = vadd.f32 %v390_v43, %v285_v44 }
 0x25b   :  { %404 = vtanh.f32 %v286_v45 }
 0x260   :  { %v288_v46 = vpop.f32.mrf.mxu3 }
 0x261   :  { %v405_v47 = vpop.eup %404  ;;  %v289_v48 = vadd.f32 %v390_v43, %v288_v46 }
 0x262   :  { %v293_v49 = vadd.f32 %v405_v47, %v244_v34 }
 0x263   :  { %406 = vtanh.f32 %v289_v48 }
 0x264   :  { %331 = vmatmul.f32.vlgmr.msrb.gmra.mxu0 %v293_v49 }
 0x269   :  { %v407_v50 = vpop.eup %406 }
 0x26a   :  { %v294_v51 = vadd.f32 %v407_v50, %v245_v36 }
 0x26c   :  { %334 = vmatmul.f32.vlgmr.msrb.gmra.mxu1 %v294_v51 }
 0x2e1   :  { %v332_v53 = vpop.f32.mrf.mxu0 }
 0x2e2   :  { %v333_v54 = vadd.f32 %v391_v52, %v332_v53 }
 0x2e4   :  { %338 = vst [vmem:[#allocation11] sm:$0xff] %v333_v54 }
 0x2e9   :  { %v335_v55 = vpop.f32.mrf.mxu1 }
 0x2ea   :  { %v336_v56 = vadd.f32 %v391_v52, %v335_v55 }
 0x2ec   :  { %339 = vst [vmem:[#allocation11 + $0x8] sm:$0xff] %v336_v56 }
 0x2ed   :  { %352 = dma.vmem_to_hbm [thread:$0]  %s345_s8, 256, %s347_s13, [#allocation4], %s561_s9, %s561_s9, %s562_s10  }
 0x2ee   :  { %558 = dma.done.wait [#allocation4], 256  }
 0x2ef   :  { %559 = vsyncadd [#allocation4], 4294967040 }
 0x2f0   :  { %357 = vsyncpa [#allocation3], 1 }
 0x2f1   :  { %358 = vsyncpa [#allocation6], 1 }
 0x2f2   :  { %359 = vsyncpa [#allocation9], 1 }
 0x2f3   :  { %360 = vsyncpa [#allocation4], 1 }

</bundles_post_ra>
